<compile_context>
chip_gen: v6e
topology: v6e:2x2x1
jax: 0.10.0
libtpu: 0.0.40
codegen_flags: <defaults>
</compile_context>

<pallas_src>
import functools
import math

import jax
import jax.numpy as jnp
from jax.experimental import pallas as pl
from jax.experimental.pallas import tpu as pltpu


_KRON_WEIGHT_MAX_BYTES = 4 * 1024 * 1024   # cap for the resident fused (kron) weight
_FUSED_FLOPS_PER_BYTE = 60.0               # conservative MXU:HBM gate (v5e-safe)


def _vmem_capacity_bytes():
    """Physical VMEM per TensorCore (128 MiB on v5e/v6e, 64 MiB on v7x)."""
    try:
        cap = int(pltpu.get_tpu_info().vmem_capacity_bytes)
        if cap > 0:
            return cap
    except Exception:
        pass
    return 64 * 1024 * 1024                # v7x-safe fallback


def _interp_matrix(in_size: int, out_size: int):
    """Row-stochastic (out_size, in_size) f32 matrix M s.t. M @ v resamples v
    bilinearly with PyTorch's align_corners=False (half-pixel) convention."""
    scale = in_size / out_size
    out_idx = jnp.arange(out_size, dtype=jnp.float32)
    src = (out_idx + 0.5) * scale - 0.5
    src = jnp.maximum(src, 0.0)                      # PyTorch clamps negatives to 0
    i0 = jnp.clip(jnp.floor(src).astype(jnp.int32), 0, in_size - 1)
    i1 = jnp.minimum(i0 + 1, in_size - 1)
    w1 = src - i0.astype(jnp.float32)
    w0 = 1.0 - w1
    rows = jnp.arange(out_size)
    m = jnp.zeros((out_size, in_size), dtype=jnp.float32)
    m = m.at[rows, i0].add(w0)
    m = m.at[rows, i1].add(w1)
    return m


# ----------------------------------------------------------------------------
# Kernels
# ----------------------------------------------------------------------------
def _fused_blocked_kernel(x_ref, y_ref, k_ref, o_ref, *, nbx):
    """Grid (N, NBX+NBY).  ci < NBX: upsample a channel block of x with one
    lane-dense MXU matmul; ci >= NBX: stream the matching y channel block into
    the same output buffer (fused concat)."""
    ci = pl.program_id(1)

    @pl.when(ci < nbx)
    def _upsample():
        o_ref[0] = jnp.dot(x_ref[0], k_ref[...],
                           preferred_element_type=jnp.float32).astype(o_ref.dtype)

    @pl.when(ci >= nbx)
    def _copy():
        o_ref[0] = y_ref[0]


def _fused_whole_kernel(x_ref, y_ref, k_ref, o_ref, *, c_x):
    """Grid (N,).  One step writes all output channels of one batch element:
    the matmul-upsampled x channels followed by the copied y channels."""
    res = jnp.dot(x_ref[0], k_ref[...], preferred_element_type=jnp.float32)
    o_ref[0, :c_x] = res.astype(o_ref.dtype)
    o_ref[0, c_x:] = y_ref[0]


def _separable_kernel(x_ref, wwt_ref, whb_ref, o_ref):
    """x_ref (1, c_t*H_x, W_x), wwt (W_x, W_y), whb = kron(I_ct, Wh)
    (c_t*H_y, c_t*H_x), o_ref (1, c_t*H_y, W_y).  Two chained 2-D MXU matmuls,
    no in-kernel reshape/transpose; result already matches the output layout."""
    t = jnp.dot(x_ref[0], wwt_ref[...], preferred_element_type=jnp.float32)
    o_ref[0] = jnp.dot(whb_ref[...], t,
                       preferred_element_type=jnp.float32).astype(o_ref.dtype)


# ----------------------------------------------------------------------------
# Wrapper
# ----------------------------------------------------------------------------
def crop_concat(x, y):
    """Equivalent of CropConcat.forward(x, y): bilinear-upsample x
    (align_corners=False) to y's (H, W), then concat along channels."""
    n, c_x, h_x, w_x = x.shape
    n_y, c_y, h_y, w_y = y.shape
    if n != n_y:
        raise ValueError("batch dims must match")
    if x.dtype != y.dtype:
        raise ValueError("x and y must share a dtype")

    dtype = x.dtype
    itemsize = jnp.dtype(dtype).itemsize
    sub = 32 // itemsize                    # sublane align: 8 f32 / 16 bf16 / 32 int8
    c_total = c_x + c_y
    in_elems = h_x * w_x
    out_elems = h_y * w_y
    in_elems_p = max(128, -(-in_elems // 128) * 128)   # lane-dense K for the MXU
    k_bytes = in_elems_p * out_elems * itemsize

    # VMEM sizing: scoped limit ~75% of physical, per-step working set ~30% of
    # the limit (double-buffer factors are already counted in the budgets).
    vmem_cap = _vmem_capacity_bytes()
    vmem_limit = min(int(vmem_cap * 0.75), 100 * 1024 * 1024)
    budget = int(vmem_limit * 0.30)

    # Weights are built in f32; only downcast for low-precision inputs so bf16
    # keeps the native bf16 MXU path (accumulation stays f32 via
    # preferred_element_type).  Small numeric divergence vs PyTorch's f32
    # interpolation math is possible for bf16 inputs.
    w_dtype = jnp.float32 if dtype == jnp.float32 else dtype
    wh = _interp_matrix(h_x, h_y)      # (H_y, H_x) f32
    ww = _interp_matrix(w_x, w_y)      # (W_y, W_x) f32

    def make_params(ndims):
        return pltpu.CompilerParams(
            dimension_semantics=("parallel",) * ndims,
            vmem_limit_bytes=vmem_limit)

    # ---- Fused (kron) feasibility: small resident weight AND FLOP inflation
    # hidden under the HBM roofline (this is what binds on v5e's slower MXU).
    fused_flops = 2.0 * n * c_x * in_elems_p * out_elems
    hbm_bytes = float((n * c_x * in_elems + n * c_y * out_elems
                       + n * c_total * out_elems) * itemsize)
    fused_ok = (k_bytes <= _KRON_WEIGHT_MAX_BYTES
                and fused_flops <= _FUSED_FLOPS_PER_BYTE * hbm_bytes)

    if fused_ok:
        # Combined bilinear operator on flattened spatial dims:
        # out_flat[c, o*W_y+p] = sum_{h,w} x_flat[c, h*W_x+w] * Wh[o,h] * Ww[p,w]
        k_mat = jnp.kron(wh, ww).T                       # (in_elems, out_elems) f32
        if in_elems_p != in_elems:
            k_mat = jnp.pad(k_mat, ((0, in_elems_p - in_elems), (0, 0)))
        k_mat = k_mat.astype(w_dtype)
        x_flat = x.reshape(n, c_x, in_elems)
        if in_elems_p != in_elems:
            x_flat = jnp.pad(x_flat, ((0, 0), (0, 0), (0, in_elems_p - in_elems)))
        y_flat = y.reshape(n, c_y, out_elems)

        def p1_bytes(cb):
            return (2 * cb * in_elems_p * itemsize       # x block (double-buffered)
                    + 2 * cb * out_elems * itemsize      # y block
                    + 2 * cb * out_elems * itemsize      # out block
                    + 2 * k_bytes                        # resident kron weight
                    + cb * out_elems * 4)                # f32 matmul result

        # Path 1: blocked concat-fused kernel.  Channel block must divide both
        # C_x and C_y (blocks never span the x/y boundary) and be sublane-aligned.
        c_b = None
        g = math.gcd(c_x, c_y)
        for d in range(g, 0, -1):
            if g % d == 0 and d % sub == 0 and p1_bytes(d) <= budget:
                c_b = d
                break

        if c_b is not None:
            nbx, nby = c_x // c_b, c_y // c_b
            # Clamped index maps: during copy steps x stays on its last block,
            # during matmul steps y stays on its first block -> Pallas skips the
            # re-fetch (no dummy DMAs on either branch).
            out_flat = pl.pallas_call(
                functools.partial(_fused_blocked_kernel, nbx=nbx),
                out_shape=jax.ShapeDtypeStruct((n, c_total, out_elems), dtype),
                grid=(n, nbx + nby),
                in_specs=[
                    pl.BlockSpec((1, c_b, in_elems_p),
                                 lambda ni, ci: (ni, jnp.minimum(ci, nbx - 1), 0)),
                    pl.BlockSpec((1, c_b, out_elems),
                                 lambda ni, ci: (ni, jnp.maximum(ci - nbx, 0), 0)),
                    pl.BlockSpec((in_elems_p, out_elems), lambda ni, ci: (0, 0)),
                ],
                out_specs=pl.BlockSpec((1, c_b, out_elems),
                                       lambda ni, ci: (ni, ci, 0)),
                compiler_params=make_params(2),
            )(x_flat, y_flat, k_mat)
            return out_flat.reshape(n, c_total, h_y, w_y)

        # Path 2: whole-channel blocks (small channel counts, e.g. the test).
        p2_bytes = (2 * c_x * in_elems_p * itemsize + 2 * c_y * out_elems * itemsize
                    + 2 * c_total * out_elems * itemsize + 2 * k_bytes
                    + c_x * out_elems * 4)
        if p2_bytes <= budget:
            out_flat = pl.pallas_call(
                functools.partial(_fused_whole_kernel, c_x=c_x),
                out_shape=jax.ShapeDtypeStruct((n, c_total, out_elems), dtype),
                grid=(n,),
                in_specs=[
                    pl.BlockSpec((1, c_x, in_elems_p), lambda ni: (ni, 0, 0)),
                    pl.BlockSpec((1, c_y, out_elems), lambda ni: (ni, 0, 0)),
                    pl.BlockSpec((in_elems_p, out_elems), lambda ni: (0, 0)),
                ],
                out_specs=pl.BlockSpec((1, c_total, out_elems),
                                       lambda ni: (ni, 0, 0)),
                compiler_params=make_params(1),
            )(x_flat, y_flat, k_mat)
            return out_flat.reshape(n, c_total, h_y, w_y)
        # otherwise fall through to the separable path

    # ---- Separable fallback (large spatial sizes / kron too FLOP- or VMEM-heavy).
    # Width interp as one (c_t*H_x, W_x)@(W_x, W_y) matmul, height interp as a
    # second matmul against block-diagonal kron(I_ct, Wh): no per-channel unroll,
    # no in-kernel reshape, store already in the (C*H_y, W_y) row layout.
    # TODO(synk): fuse the concat here too (as in Path 1) and add H_y tiling for
    # inputs whose single-channel tile exceeds the VMEM budget.
    w_itemsize = jnp.dtype(w_dtype).itemsize

    def sep_bytes(ct):
        return (2 * ct * h_x * w_x * itemsize            # x block
                + 2 * ct * h_y * w_y * itemsize          # out block
                + ct * h_x * w_y * 4                     # f32 width-interp intermediate
                + 2 * (ct * h_y) * (ct * h_x) * w_itemsize   # block-diag height weight
                + 2 * w_x * w_y * w_itemsize)            # width weight

    def sep_aligned(ct):
        return ((ct * h_x) % sub == 0 and (ct * h_y) % sub == 0) or ct == c_x

    divisors = [d for d in range(1, c_x + 1) if c_x % d == 0 and sep_aligned(d)]
    # Cap c_t at 16: the block-diagonal height matmul inflates FLOPs by c_t.
    fitting = [d for d in divisors if d <= 16 and sep_bytes(d) <= budget]
    if fitting:
        c_t = max(fitting)
    else:
        in_budget = [d for d in divisors if sep_bytes(d) <= budget]
        c_t = min(in_budget) if in_budget else min(divisors)

    wwt_k = ww.T.astype(w_dtype)                                     # (W_x, W_y)
    whb_k = jnp.kron(jnp.eye(c_t, dtype=jnp.float32), wh).astype(w_dtype)
    x3 = x.reshape(n, c_x * h_x, w_x)
    x_up = pl.pallas_call(
        _separable_kernel,
        out_shape=jax.ShapeDtypeStruct((n, c_x * h_y, w_y), dtype),
        grid=(n, c_x // c_t),
        in_specs=[
            pl.BlockSpec((1, c_t * h_x, w_x), lambda ni, ci: (ni, ci, 0)),
            pl.BlockSpec((w_x, w_y), lambda ni, ci: (0, 0)),
            pl.BlockSpec((c_t * h_y, c_t * h_x), lambda ni, ci: (0, 0)),
        ],
        out_specs=pl.BlockSpec((1, c_t * h_y, w_y), lambda ni, ci: (ni, ci, 0)),
        compiler_params=make_params(2),
    )(x3, wwt_k, whb_k)
    x_up = x_up.reshape(n, c_x, h_y, w_y)
    return jnp.concatenate([x_up, y], axis=1)


def _reference(x, y):
    """Pure-JAX reference (same half-pixel bilinear convention as PyTorch)."""
    _, _, h_y, w_y = y.shape
    wh = _interp_matrix(x.shape[2], h_y)
    ww = _interp_matrix(x.shape[3], w_y)
    x_up = jnp.einsum('oh,nchw,pw->ncop', wh, x.astype(jnp.float32), ww)
    return jnp.concatenate([x_up.astype(x.dtype), y], axis=1)


if __name__ == "__main__":
    key = jax.random.PRNGKey(0)
    kx, ky = jax.random.split(key)
    # x is the low-resolution decoder feature, y is the skip connection.
    x = jax.random.normal(kx, (2, 4, 8, 8), dtype=jnp.float32)
    y = jax.random.normal(ky, (2, 4, 16, 16), dtype=jnp.float32)

    out = jax.block_until_ready(crop_concat(x, y))

    ref = _reference(x, y)
    assert out.shape == (2, 8, 16, 16), out.shape
    assert jnp.allclose(out, ref, atol=1e-5, rtol=1e-5), "mismatch vs reference"

    print("KERNEL_OK")
</pallas_src>

<mosaic_0001>
module attributes {stable_mosaic.version = 11 : i64} {
  func.func @_fused_whole_kernel(%arg0: i32, %arg1: memref<1x4x128xf32, #tpu.memory_space<vmem>>, %arg2: memref<1x4x256xf32, #tpu.memory_space<vmem>>, %arg3: memref<128x256xf32, #tpu.memory_space<vmem>>, %arg4: memref<1x8x256xf32, #tpu.memory_space<vmem>>) attributes {dimension_semantics = [#tpu.dimension_semantics<parallel>], iteration_bounds = array<i64: 2>, scalar_prefetch = 0 : i64, scratch_operands = 0 : i64, tpu.core_type = #tpu.core_type<tc>, window_params = [{transform_indices = @transform_0, window_bounds = array<i64: 1, 4, 128>}, {transform_indices = @transform_1, window_bounds = array<i64: 1, 4, 256>}, {pipeline_mode = #tpu.pipeline_mode<synchronous>, transform_indices = @transform_2, window_bounds = array<i64: 128, 256>}, {transform_indices = @transform_3, window_bounds = array<i64: 1, 8, 256>}]} {
    %c0 = arith.constant 0 : index
    %c0_0 = arith.constant 0 : index
    %c0_1 = arith.constant 0 : index
    %0 = vector.load %arg1[%c0, %c0_0, %c0_1] : memref<1x4x128xf32, #tpu.memory_space<vmem>>, vector<1x4x128xf32>
    %1 = vector.shape_cast %0 : vector<1x4x128xf32> to vector<4x128xf32>
    %c0_2 = arith.constant 0 : index
    %c0_3 = arith.constant 0 : index
    %2 = vector.load %arg3[%c0_2, %c0_3] : memref<128x256xf32, #tpu.memory_space<vmem>>, vector<128x256xf32>
    %cst = arith.constant dense<0.000000e+00> : vector<4x256xf32>
    %3 = tpu.matmul %1, %2, %cst {dimension_numbers = #tpu.dot_dimension_numbers<[1], [0], [0], [1], [0, 0, 1, 1], [], []>} : vector<4x128xf32>, vector<128x256xf32>, vector<4x256xf32> -> vector<4x256xf32>
    %c0_4 = arith.constant 0 : index
    %c0_5 = arith.constant 0 : index
    %c0_6 = arith.constant 0 : index
    %4 = vector.load %arg4[%c0_4, %c0_5, %c0_6] : memref<1x8x256xf32, #tpu.memory_space<vmem>>, vector<1x4x256xf32>
    %5 = vector.shape_cast %4 : vector<1x4x256xf32> to vector<4x256xf32>
    %6 = vector.shape_cast %3 : vector<4x256xf32> to vector<1x4x256xf32>
    tpu.vector_store %arg4[%c0_4, %c0_5, %c0_6], %6 {strides = array<i32>} : memref<1x8x256xf32, #tpu.memory_space<vmem>>, vector<1x4x256xf32>,
    %c0_7 = arith.constant 0 : index
    %c0_8 = arith.constant 0 : index
    %c0_9 = arith.constant 0 : index
    %7 = vector.load %arg2[%c0_7, %c0_8, %c0_9] : memref<1x4x256xf32, #tpu.memory_space<vmem>>, vector<1x4x256xf32>
    %8 = vector.shape_cast %7 : vector<1x4x256xf32> to vector<4x256xf32>
    %c0_10 = arith.constant 0 : index
    %c4 = arith.constant 4 : index
    %c0_11 = arith.constant 0 : index
    %9 = vector.load %arg4[%c0_10, %c4, %c0_11] : memref<1x8x256xf32, #tpu.memory_space<vmem>>, vector<1x4x256xf32>
    %10 = vector.shape_cast %9 : vector<1x4x256xf32> to vector<4x256xf32>
    %11 = vector.shape_cast %8 : vector<4x256xf32> to vector<1x4x256xf32>
    tpu.vector_store %arg4[%c0_10, %c4, %c0_11], %11 {strides = array<i32>} : memref<1x8x256xf32, #tpu.memory_space<vmem>>, vector<1x4x256xf32>,
    return
  }
  func.func @transform_0(%arg0: i32) -> (i32, i32, i32) {
    %c0_i32 = arith.constant 0 : i32
    %c0_i32_0 = arith.constant 0 : i32
    %c0_i32_1 = arith.constant 0 : i32
    return %arg0, %c0_i32, %c0_i32_0 : i32, i32, i32
  }
  func.func @transform_1(%arg0: i32) -> (i32, i32, i32) {
    %c0_i32 = arith.constant 0 : i32
    %c0_i32_0 = arith.constant 0 : i32
    %c0_i32_1 = arith.constant 0 : i32
    return %arg0, %c0_i32, %c0_i32_0 : i32, i32, i32
  }
  func.func @transform_2(%arg0: i32) -> (i32, i32) {
    %c0_i32 = arith.constant 0 : i32
    %c0_i32_0 = arith.constant 0 : i32
    %c0_i32_1 = arith.constant 0 : i32
    return %c0_i32, %c0_i32_0 : i32, i32
  }
  func.func @transform_3(%arg0: i32) -> (i32, i32, i32) {
    %c0_i32 = arith.constant 0 : i32
    %c0_i32_0 = arith.constant 0 : i32
    %c0_i32_1 = arith.constant 0 : i32
    return %arg0, %c0_i32, %c0_i32_0 : i32, i32, i32
  }
}

</mosaic_0001>

<bundles_post_ra>
// kernel: tpu_custom_call.1
= control target key start
LH: loop header
LB: loop body
LE: loop exit
PB: predicated region body
PF: predicated region fallthrough
CT: control target
= control target key end

     0   :  { %8 = vsyncpa [#allocation3], 0  ;;  %s948_s0 = inlined_call_operand.hbm [shape: f32[2,4,128], index: 0, kind: input, shape index: {}]   ;;  %s949_s1 = inlined_call_operand.hbm [shape: f32[2,4,256], index: 1, kind: input, shape index: {}]   ;;  %s950_s2 = inlined_call_operand.hbm [shape: f32[128,256], index: 2, kind: input, shape index: {}]   ;;  %s951_s3 = inlined_call_operand.hbm [shape: f32[2,8,256], index: 3, kind: output, shape index: {}]  }
   0x1   :  { %10 = vsyncpa [#allocation3 + $0x1], 0 }
   0x2   :  { %11 = vsyncpa [#allocation6], 0 }
   0x3   :  { %13 = vsyncpa [#allocation6 + $0x1], 0 }
   0x4   :  { %14 = vsyncpa [#allocation4], 0 }
   0x5   :  { %16 = vsyncpa [#allocation4 + $0x1], 0  ;;  %s737_s12 = smov 0   ;;  %s739_s13 = smov 0  }
   0x6   :  { %s741_s14 = smov 0   ;;  %s743_s15 = smov 0  }
   0x7 LB: > { %s758_s16 = sadd.s32 4294967295, %s708_s15   ;;  %s467_s17 = sadd.s32 4294967294, %s708_s15   ;;  %s708_s15 = sphi %s743_s15, %s973_s15   ;;  %s704_s14 = sphi %s741_s14, %s972_s14   ;;  %s700_s13 = sphi %s739_s13, %s971_s13   ;;  %s696_s12 = sphi %s737_s12, %s970_s12  }
   0x8   : > { %p42_p0 = scmp.ne.s32.totalorder %s700_s13, %s696_s12  ;;  %p952_p1 = scmp.eq.s32.totalorder %s758_s16, 0 }
   0x9   : > { %p119_p3 = scmp.eq.s32.totalorder %s467_s17, 1  ;;  %p468_p5 = scmp.ge.s32.totalorder %s708_s15, 1 }
   0xa   : > { %p767_p4 = por %p952_p1, %p42_p0  ;;  %p126_p7 = scmp.lt.s32.totalorder %s708_s15, 3 }
   0xb   : > { %p772_p6 = por %p119_p3, %p42_p0  ;;  %s710_s21 = smov [#allocation7]  }
   0xc   : > { %s956_s18 = scalar_select %p767_p4, 1, 0 }
   0xd   : > { %s957_s19 = scalar_select %p772_p6, 1, 0 }
   0xe   : > { %p777_p8 = pnand %p468_p5, %p126_p7  ;;  %s138_s22 = sshll.u32 %s710_s21, 4  ;;  %s139_s22 = int_to_ptr.vmem [resolvable:$true] %s138_s22 }
   0xf   : > { %s791_s24 = sadd.s32 1, %s708_s15   ;;  %s29_s25 = sadd.s32 1, %s704_s14 }
  0x10   : > { %s958_s20 = scalar_select %p777_p8, 1, 0 }
  0x11   : > { %p498_p9 = pneg %p777_p8  ;;  %s26_s26 = ssub.s32 %s708_s15, %s791_s24 }
  0x12   : > { %s565_s27 = scalar_lea.vmem %s139_s22, 4096  ;;  %p573_p5 = scmp.lt.s32.totalorder %s139_s22, %s139_s22 }
  0x13   : > { %p786_p11 = pnand %p498_p9, %p952_p1  ;;  %p566_p13 = scmp.ne.s32.totalorder %s139_s22, %s565_s27 }
  0x14   : > { %p574_p7 = scmp.lt.s32.totalorder %s565_s27, %s565_s27 }
  0x15   : > { %p556_p12 = pneg %p786_p11 }
  0x16   : > { %p575_p10 = por %p574_p7, %p573_p5 }
  0x17   : > { %p568_p0 = pnand %p566_p13, %p556_p12 }
  0x19   : > { %p569_p3 = pneg %p568_p0 }
  0x1b   : > { %p576_p2 = pnand %p575_p10, %p569_p3 }
  0x1d   : > { %579 = shalt.err (!%p576_p2)
}
  0x1e   : > { %s711_s28 = smov 256   ;;  %s712_s29 = smov 16  }
  0x1f   : > { %501 = dma.hbm_to_vmem [thread:$0]  (!%p786_p11), %s950_s2, 4096, %s139_s22, [#allocation6], %s711_s28, %s711_s28, %s712_s29  }
  0x20   : > { %p27_p9 = scmp.eq.s32.totalorder %s26_s26, 0  ;;  %p36_p10 = scmp.ne.s32.totalorder %s704_s14, %s700_s13 }
  0x21   : > { %p37_p2 = scmp.eq.s32.totalorder %s708_s15, 0  ;;  %p514_p12 = scmp.lt.s32.totalorder %s708_s15, 2 }
  0x22   : > { %s808_s5 = scalar_select %p27_p9, %s704_s14, %s29_s25  }
  0x23   : > { %p38_p13 = por %p37_p2, %p36_p10  ;;  %p960_p0 = scmp.eq.s32.totalorder %s758_s16, 1 }
  0x24   : > { %s817_s7 = sand.u32 1, %s704_s14   ;;  %s472_s8 = sshll.u32 %s708_s15, 6 }
  0x25   : > { %p812_p3 = por %p960_p0, %p36_p10  ;;  %s471_s9 = sshll.u32 %s817_s7, 2 }
  0x26   : > { %s824_s17 = scalar_lea.hbm %s948_s0, %s472_s8  ;;  %s156_s21 = scalar_lea.vmem [#allocation2], %s471_s9 }
  0x27   : > { %s961_s6 = scalar_select %p812_p3, 1, 0 }
  0x28   : > { %s163_s22 = sshll.u32 %s156_s21, 4  ;;  %p826_p11 = pnand %p514_p12, %p38_p13  ;;  %s164_s22 = int_to_ptr.vmem [resolvable:$true] %s163_s22 }
  0x29   : > { %s170_s25 = sand.u32 1, %s708_s15   ;;  %s153_s26 = scalar_lea.sflag [#allocation3], %s817_s7 }
  0x2a   : > { %s580_s27 = scalar_lea.hbm %s824_s17, 64  ;;  %p582_p7 = pneg %p826_p11 }
  0x2b   : > { %p581_p5 = scmp.ne.s32.totalorder %s824_s17, %s580_s27  ;;  %s585_s30 = scalar_lea.hbm %s948_s0, 128 }
  0x2c   : > { %p586_p2 = scmp.lt.s32.totalorder %s824_s17, %s948_s0  ;;  %p587_p12 = scmp.lt.s32.totalorder %s585_s30, %s580_s27 }
  0x2d   : > { %p583_p9 = pnand %p582_p7, %p581_p5 }
  0x2e   : > { %p588_p13 = por %p587_p12, %p586_p2 }
  0x2f   : > { %p584_p10 = pneg %p583_p9 }
  0x31   : > { %p589_p0 = pnand %p588_p13, %p584_p10 }
  0x33   : > { %592 = shalt.err (!%p589_p0)
}
  0x34   : > { %s593_s9 = scalar_lea.vmem %s164_s22, 64  ;;  %s713_s10 = smov [#allocation2]  }
  0x35   : > { %p594_p1 = scmp.ne.s32.totalorder %s164_s22, %s593_s9  ;;  %s598_s11 = sshll.u32 %s713_s10, 4  ;;  %s599_s11 = int_to_ptr.vmem [resolvable:$false] %s598_s11 }
  0x36   : > { %s600_s21 = scalar_lea.vmem %s599_s11, 128  ;;  %p601_p9 = scmp.lt.s32.totalorder %s164_s22, %s599_s11 }
  0x37   : > { %p596_p6 = pnand %p594_p1, %p582_p7  ;;  %p602_p3 = scmp.lt.s32.totalorder %s600_s21, %s593_s9 }
  0x39   : > { %p597_p5 = pneg %p596_p6  ;;  %p603_p4 = por %p602_p3, %p601_p9 }
  0x3b   : > { %p604_p8 = pnand %p603_p4, %p597_p5 }
  0x3d   : > { %607 = shalt.err (!%p604_p8)
}
  0x3e   : > { %505 = dma.hbm_to_vmem [thread:$0]  (!%p826_p11), %s824_s17, 64, %s164_s22, %s153_s26  }
  0x3f   : > { %s473_s27 = sshll.u32 %s817_s7, 3  ;;  %s486_s28 = sshll.u32 %s708_s15, 7 }
  0x40   : > { %s857_s4 = scalar_lea.hbm %s949_s1, %s486_s28  ;;  %s174_s8 = scalar_lea.vmem [#allocation5], %s473_s27 }
  0x41   : > { %s182_s9 = sshll.u32 %s174_s8, 4  ;;  %s171_s10 = scalar_lea.sflag [#allocation6], %s170_s25  ;;  %s183_s9 = int_to_ptr.vmem [resolvable:$true] %s182_s9 }
  0x42   : > { %s608_s11 = scalar_lea.hbm %s857_s4, 128  ;;  %s613_s22 = scalar_lea.hbm %s949_s1, 256 }
  0x43   : > { %p609_p1 = scmp.ne.s32.totalorder %s857_s4, %s608_s11  ;;  %p614_p8 = scmp.lt.s32.totalorder %s857_s4, %s949_s1 }
  0x44   : > { %p615_p3 = scmp.lt.s32.totalorder %s613_s22, %s608_s11 }
  0x45   : > { %p611_p4 = pnand %p609_p1, %p582_p7 }
  0x46   : > { %p616_p10 = por %p615_p3, %p614_p8 }
  0x47   : > { %p612_p6 = pneg %p611_p4 }
  0x49   : > { %p617_p2 = pnand %p616_p10, %p612_p6 }
  0x4b   : > { %620 = shalt.err (!%p617_p2)
}
  0x4c   : > { %s621_s27 = scalar_lea.vmem %s183_s9, 128  ;;  %s714_s25 = smov [#allocation5]  }
  0x4d   : > { %p622_p12 = scmp.ne.s32.totalorder %s183_s9, %s621_s27  ;;  %s626_s28 = sshll.u32 %s714_s25, 4  ;;  %s627_s28 = int_to_ptr.vmem [resolvable:$false] %s626_s28 }
  0x4e   : > { %s628_s29 = scalar_lea.vmem %s627_s28, 256  ;;  %p629_p5 = scmp.lt.s32.totalorder %s183_s9, %s627_s28 }
  0x4f   : > { %p624_p13 = pnand %p622_p12, %p582_p7  ;;  %p630_p9 = scmp.lt.s32.totalorder %s628_s29, %s621_s27 }
  0x51   : > { %p625_p0 = pneg %p624_p13  ;;  %p631_p1 = por %p630_p9, %p629_p5 }
  0x53   : > { %p632_p4 = pnand %p631_p1, %p625_p0 }
  0x55   : > { %635 = shalt.err (!%p632_p4)
}
  0x56   : > { %508 = dma.hbm_to_vmem [thread:$0]  (!%p826_p11), %s857_s4, 128, %s183_s9, %s171_s10  }
  0x57   : > { %p963_p6 = scmp.ne.s32.totalorder %s958_s20, 0 }
  0x58   : > { %s882_s30 = sand.u32 (!%p963_p6), 1, %s700_s13   ;;  %p964_p7 = scmp.ne.s32.totalorder (!%p963_p6), %s956_s18, 0 }
  0x59   : > { %191 = sbr.rel (%p963_p6) target bundleno = 342 (0x156), region = 32  ;;  %s477_s8 = sshll.u32 (!%p963_p6), %s882_s30, 2 }
  0x5a   : > { %s194_s11 = scalar_lea.sflag (!%p963_p6), [#allocation3], %s882_s30  ;;  %s886_s7 = scalar_lea.vmem (!%p963_p6), [#allocation2], %s477_s8 }
  0x5e   : > { %679 = dma.done.wait (%p964_p7), %s194_s11, 64  }
  0x5f   : > { %681 = vsyncadd (%p964_p7), %s194_s11, 4294967232  ;;  %s202_s20 = sand.u32 1, %s758_s16   ;;  %s478_s23 = sshll.u32 %s882_s30, 3 }
  0x60   : > { %s203_s4 = scalar_lea.sflag [#allocation6], %s202_s20  ;;  %s894_s9 = scalar_lea.vmem [#allocation5], %s478_s23 }
  0x61   : > { %683 = dma.done.wait (%p964_p7), %s203_s4, 128  }
  0x62   : > { %685 = vsyncadd (%p964_p7), %s203_s4, 4294967168  ;;  %p965_p11 = scmp.eq.s32.totalorder %s758_s16, 0 }
  0x64   : > { %687 = dma.done.wait (%p965_p11), [#allocation6], 4096   ;;  %p966_p8 = pmov %p965_p11 }
  0x65   : > { %v715_v0 = vmov 0.0   ;;  %v270_v1 = vld [vmem:[#allocation7 + $0xf8] sm:$0xff]  ;;  %v269_v2 = vld [vmem:[#allocation7 + $0xf0] sm:$0xff]  ;;  %v268_v3 = vld [vmem:[#allocation7 + $0xe8] sm:$0xff]  ;;  %s480_s18 = sshll.u32 %s882_s30, 4  ;;  %s487_s22 = sshll.u32 %s758_s16, 8 }
  0x66   : > { %689 = vsyncadd (%p966_p8), [#allocation6], 4294963200  ;;  %335 = vmatprep.mubr.f32.mxu0 %v715_v0  ;;  %271 = vmatprep.subr.mxu0 %v270_v1  ;;  %v267_v4 = vld [vmem:[#allocation7 + $0xe0] sm:$0xff]  ;;  %v266_v5 = vld [vmem:[#allocation7 + $0xd8] sm:$0xff]  ;;  %s237_s10 = scalar_lea.vmem [#allocation8], %s480_s18  ;;  %s363_s27 = scalar_lea.hbm %s951_s3, %s487_s22 }
  0x67   : > { %272 = vmatpush1.msra.mxu0 %v269_v2  ;;  %v265_v6 = vld [vmem:[#allocation7 + $0xd0] sm:$0xff]  ;;  %v264_v7 = vld [vmem:[#allocation7 + $0xc8] sm:$0xff]  ;;  %v263_v8 = vld [vmem:[#allocation7 + $0xc0] sm:$0xff]  ;;  %s365_s17 = sshll.u32 %s237_s10, 4  ;;  %s351_s25 = scalar_lea.sflag [#allocation4], %s882_s30  ;;  %s908_s17 = int_to_ptr.vmem [resolvable:$true] %s365_s17 }
  0x68   : > { %273 = vmatprep.subr.mxu0 %v268_v3  ;;  %v262_v9 = vld [vmem:[#allocation7 + $0xb8] sm:$0xff]  ;;  %v261_v10 = vld [vmem:[#allocation7 + $0xb0] sm:$0xff]  ;;  %v260_v11 = vld [vmem:[#allocation7 + $0xa8] sm:$0xff]  ;;  %s636_s28 = scalar_lea.vmem %s908_s17, 256  ;;  %p967_p10 = scmp.ne.s32.totalorder %s961_s6, 0 }
  0x69   : > { %274 = vmatpush1.msra.mxu0 %v267_v4  ;;  %v259_v12 = vld [vmem:[#allocation7 + $0xa0] sm:$0xff]  ;;  %v258_v13 = vld [vmem:[#allocation7 + $0x98] sm:$0xff]  ;;  %v257_v14 = vld [vmem:[#allocation7 + $0x90] sm:$0xff]  ;;  %p637_p3 = scmp.ne.s32.totalorder %s908_s17, %s636_s28  ;;  %s716_s16 = smov [#allocation8]  }
  0x6a   : > { %275 = vmatprep.subr.mxu0 %v266_v5  ;;  %v256_v15 = vld [vmem:[#allocation7 + $0x88] sm:$0xff]  ;;  %v255_v16 = vld [vmem:[#allocation7 + $0x80] sm:$0xff]  ;;  %v254_v17 = vld [vmem:[#allocation7 + $0x78] sm:$0xff]  ;;  %s640_s29 = sshll.u32 %s716_s16, 4  ;;  %s641_s29 = int_to_ptr.vmem [resolvable:$false] %s640_s29 }
  0x6b   : > { %276 = vmatpush1.msra.mxu0 %v265_v6  ;;  %v253_v18 = vld [vmem:[#allocation7 + $0x70] sm:$0xff]  ;;  %v252_v19 = vld [vmem:[#allocation7 + $0x68] sm:$0xff]  ;;  %v251_v20 = vld [vmem:[#allocation7 + $0x60] sm:$0xff]  ;;  %p638_p2 = pnand %p637_p3, %p967_p10  ;;  %s642_s8 = scalar_lea.vmem %s641_s29, 512 }
  0x6c   : > { %277 = vmatprep.subr.mxu0 %v264_v7  ;;  %v250_v21 = vld [vmem:[#allocation7 + $0x58] sm:$0xff]  ;;  %v249_v22 = vld [vmem:[#allocation7 + $0x50] sm:$0xff]  ;;  %v248_v23 = vld [vmem:[#allocation7 + $0x48] sm:$0xff]  ;;  %p643_p13 = scmp.lt.s32.totalorder %s908_s17, %s641_s29  ;;  %p644_p0 = scmp.lt.s32.totalorder %s642_s8, %s636_s28 }
  0x6d   : > { %278 = vmatpush1.msra.mxu0 %v263_v8  ;;  %v247_v24 = vld [vmem:[#allocation7 + $0x40] sm:$0xff]  ;;  %v246_v25 = vld [vmem:[#allocation7 + $0x38] sm:$0xff]  ;;  %v245_v26 = vld [vmem:[#allocation7 + $0x30] sm:$0xff]  ;;  %p639_p12 = pneg %p638_p2 }
  0x6e   : > { %279 = vmatprep.subr.mxu0 %v262_v9  ;;  %v244_v27 = vld [vmem:[#allocation7 + $0x28] sm:$0xff]  ;;  %v243_v28 = vld [vmem:[#allocation7 + $0x20] sm:$0xff]  ;;  %v242_v29 = vld [vmem:[#allocation7 + $0x18] sm:$0xff]  ;;  %p645_p5 = por %p644_p0, %p643_p13 }
  0x6f   : > { %280 = vmatpush1.msra.mxu0 %v261_v10  ;;  %v241_v30 = vld [vmem:[#allocation7 + $0x10] sm:$0xff]  ;;  %v240_v31 = vld [vmem:[#allocation7 + $0x8] sm:$0xff]  ;;  %v239_v32 = vld [vmem:[#allocation7] sm:$0xff] }
  0x70   : > { %281 = vmatprep.subr.mxu0 %v260_v11  ;;  %v238_v33 = vld [vmem:[%s886_s7] sm:$0xf]  ;;  %v344_v34 = vld [vmem:[%s894_s9] sm:$0xff]  ;;  %p646_p9 = pnand %p645_p5, %p639_p12 }
  0x71   : > { %282 = vmatpush1.msra.mxu0 %v259_v12  ;;  %v346_v35 = vcombine.low %v344_v34, %v344_v34  ;;  %349 = vst [vmem:[%s237_s10 + $0x8] sm:$0xf0] %v344_v34 }
  0x72   : > { %283 = vmatprep.subr.mxu0 %v258_v13 }
  0x73   : > { %284 = vmatpush1.msra.mxu0 %v257_v14  ;;  %348 = vst [vmem:[%s237_s10] sm:$0xf0] %v346_v35 }
  0x74   : > { %285 = vmatprep.subr.mxu0 %v256_v15 }
  0x75   : > { %286 = vmatpush1.msra.mxu0 %v255_v16 }
  0x76   : > { %287 = vmatprep.subr.mxu0 %v254_v17 }
  0x77   : > { %288 = vmatpush1.msra.mxu0 %v253_v18 }
  0x78   : > { %289 = vmatprep.subr.mxu0 %v252_v19 }
  0x79   : > { %290 = vmatpush1.msra.mxu0 %v251_v20 }
  0x7a   : > { %291 = vmatprep.subr.mxu0 %v250_v21 }
  0x7b   : > { %292 = vmatpush1.msra.mxu0 %v249_v22 }
  0x7c   : > { %293 = vmatprep.subr.mxu0 %v248_v23 }
  0x7d   : > { %294 = vmatpush1.msra.mxu0 %v247_v24 }
  0x7e   : > { %295 = vmatprep.subr.mxu0 %v246_v25 }
  0x7f   : > { %296 = vmatpush1.msra.mxu0 %v245_v26 }
  0x80   : > { %297 = vmatprep.subr.mxu0 %v244_v27 }
  0x81   : > { %298 = vmatpush1.msra.mxu0 %v243_v28 }
  0x82   : > { %299 = vmatprep.subr.mxu0 %v242_v29 }
  0x83   : > { %300 = vmatpush1.msra.mxu0 %v241_v30 }
  0x84   : > { %301 = vmatprep.subr.mxu0 %v240_v31 }
  0x85   : > { %302 = vmatpush1.msra.mxu0 %v239_v32 }
  0x86   : > { %336 = vmatmul.mubr.f32.vlgmr.msra.gmra.mxu0 %v238_v33 }
 0x146   : > { %v337_v36 = vpop.f32.mrf.mxu0 }
 0x147   : > { %342 = vst [vmem:[%s237_s10] sm:$0xf] %v337_v36 }
 0x148   : > { %v339_v37 = vpop.f32.mrf.mxu0 }
 0x149   : > { %343 = vst [vmem:[%s237_s10 + $0x8] sm:$0xf] %v339_v37 }
 0x14a   : > { %649 = shalt.err (!%p646_p9)
}
 0x14b   : > { %s650_s11 = scalar_lea.hbm %s363_s27, 256  ;;  %s654_s20 = scalar_lea.hbm %s951_s3, 512 }
 0x14c   : > { %p651_p1 = scmp.ne.s32.totalorder %s363_s27, %s650_s11  ;;  %p655_p7 = scmp.lt.s32.totalorder %s363_s27, %s951_s3 }
 0x14d   : > { %p656_p11 = scmp.lt.s32.totalorder %s654_s20, %s650_s11 }
 0x14e   : > { %p652_p4 = pnand %p651_p1, %p967_p10 }
 0x14f   : > { %p657_p8 = por %p656_p11, %p655_p7 }
 0x150   : > { %p653_p6 = pneg %p652_p4 }
 0x152   : > { %p658_p3 = pnand %p657_p8, %p653_p6 }
 0x154   : > { %661 = shalt.err (!%p658_p3)
}
 0x155   : > { %496 = dma.vmem_to_hbm [thread:$0]  (%p967_p10), %s908_s17, 256, %s363_s27, %s351_s25  }
 0x156 PF: > { %s377_s9 = sand.u32 1, %s696_s12   ;;  %p968_p2 = scmp.ne.s32.totalorder %s957_s19, 0 }
 0x157   : > { %p969_p12 = scmp.ge.s32.totalorder %s708_s15, 2  ;;  %s378_s18 = scalar_lea.sflag [#allocation4], %s377_s9 }
 0x159   : > { %p510_p13 = pnand %p969_p12, %p968_p2 }
 0x15b   : > { %p511_p0 = pneg %p510_p13 }
 0x15d   : > { %691 = dma.done.wait (%p511_p0), %s378_s18, 256  }
 0x15e   : > { %693 = vsyncadd (%p511_p0), %s378_s18, 4294967040  ;;  %p19_p5 = scmp.ge.s32.totalorder %s791_s24, 4   ;;  %s970_s12 = smov %s700_s13 }
 0x15f   : > { %s971_s13 = smov %s704_s14  ;;  %s972_s14 = smov %s808_s5 }
 0x160   : > { %s973_s15 = smov %s791_s24  ;;  %21 = sbr.rel (!%p19_p5) target bundleno = 7 (0x7), region = 94 }
 0x165   :  { %383 = vsyncpa [#allocation3], 1 }
 0x166   :  { %385 = vsyncpa [#allocation3 + $0x1], 1 }
 0x167   :  { %386 = vsyncpa [#allocation6], 1 }
 0x168   :  { %388 = vsyncpa [#allocation6 + $0x1], 1 }
 0x169   :  { %389 = vsyncpa [#allocation4], 1 }
 0x16a   :  { %391 = vsyncpa [#allocation4 + $0x1], 1 }

</bundles_post_ra>
